<compile_context>
chip_gen: v6e
topology: v6e:2x2x1
jax: 0.10.0
libtpu: 0.0.40
codegen_flags: <defaults>
</compile_context>

<pallas_src>
import functools

import jax
import jax.numpy as jnp
from jax.experimental import pallas as pl
from jax.experimental.pallas import tpu as pltpu

LANES = 128
MAX_BLOCK_ROWS = 4096      # 4096 x 128 f32 = 2 MiB per input plane per buffer


def _round_up(x, m):
    return ((x + m - 1) // m) * m


def _dpo_kernel(pi_ref, ref_ref, stats_ref, accfull_ref, *,
                beta, n_valid, block_rows, first_partial_block, num_blocks):
    j = pl.program_id(0)

    pi = pi_ref[...].astype(jnp.float32)    # signed policy log-ratio (chosen - rejected)
    rf = ref_ref[...].astype(jnp.float32)   # signed reference log-ratio
    z = beta * (pi - rf)

    # -logsigmoid(z) == softplus(-z) == max(-z, 0) + log1p(exp(-|z|))   (stable)
    loss_e = jnp.maximum(-z, 0.0) + jnp.log1p(jnp.exp(-jnp.abs(z)))
    pred = z > 0.0

    # Full per-element accuracy plane as int8 (padded tail sliced off in wrapper).
    accfull_ref[...] = pred.astype(jnp.int8)
    acc_f = pred.astype(jnp.float32)

    def fold(x):
        # (block_rows, 128) -> (8, 128): pure VPU adds; the single cross-lane
        # reduce is deferred to the tiny wrapper epilogue.
        return x.reshape(block_rows // 8, 8, LANES).sum(axis=0)

    def write_stats(mask):
        if mask is None:
            l, p_, r_, a = loss_e, pi, rf, acc_f
        else:
            l, p_, r_, a = loss_e * mask, pi * mask, rf * mask, acc_f * mask
        stats_ref[0, 0:8, :] = fold(l)
        stats_ref[0, 8:16, :] = fold(p_)
        stats_ref[0, 16:24, :] = fold(r_)
        stats_ref[0, 24:32, :] = fold(a)

    def write_masked():
        # Row-index comparison (no flat element index -> no int32 overflow risk).
        row0 = j * block_rows
        r = jax.lax.broadcasted_iota(jnp.int32, (block_rows, LANES), 0) + row0
        full_rows = n_valid // LANES
        rem = n_valid % LANES
        valid = r < full_rows
        if rem:
            c = jax.lax.broadcasted_iota(jnp.int32, (block_rows, LANES), 1)
            valid = valid | ((r == full_rows) & (c < rem))
        write_stats(valid.astype(jnp.float32))

    if first_partial_block >= num_blocks:
        write_stats(None)              # no padding anywhere: never build the mask
    elif first_partial_block == 0:
        write_masked()                 # every block may contain padding (tiny inputs)
    else:
        @pl.when(j < first_partial_block)
        def _():
            write_stats(None)          # fully-valid block: unmasked fold, no iotas

        @pl.when(j >= first_partial_block)
        def _():
            write_masked()             # only the ragged tail pays for the mask


@functools.partial(jax.jit, static_argnames=("beta",))
def dpo_loss(logprobs, ref_logprobs, choices, *, beta):
    """logprobs/ref_logprobs: (S, B, T, 2); choices: (B, T, 1) with hard {0,1} labels."""
    S, B, T, two = logprobs.shape
    assert two == 2
    ch = choices.reshape(B, T)
    sign = (1 - 2 * ch).astype(jnp.float32)       # +1 for choice 0, -1 for choice 1

    # Signed margin planes == (chosen - rejected); subtraction done in f32.
    pi_lr = sign[None] * (logprobs[..., 0].astype(jnp.float32)
                          - logprobs[..., 1].astype(jnp.float32))       # (S, B, T)
    ref_lr = sign[None] * (ref_logprobs[..., 0].astype(jnp.float32)
                           - ref_logprobs[..., 1].astype(jnp.float32))  # (S, B, T)

    n = S * B * T
    rows = -(-n // LANES)
    rows32 = _round_up(rows, 32)                  # int8 output wants sublane mult of 32
    # Adaptive block count: no chunk rounding; >=2 blocks (when data allows) so the
    # "parallel" grid axis can be sharded across TensorCores on megacore parts.
    num_blocks = max(-(-rows32 // MAX_BLOCK_ROWS), 2 if rows32 >= 64 else 1)
    block_rows = _round_up(-(-rows32 // num_blocks), 32)
    total_rows = num_blocks * block_rows
    n_padded = total_rows * LANES
    first_partial_block = n // (block_rows * LANES)   # first block containing padding

    def to_lane_dense(x):
        flat = x.reshape(-1)
        flat = jnp.pad(flat, (0, n_padded - n))       # fuses with the margin compute under jit
        return flat.reshape(total_rows, LANES)

    pi2 = to_lane_dense(pi_lr)
    rf2 = to_lane_dense(ref_lr)

    kernel = functools.partial(
        _dpo_kernel, beta=float(beta), n_valid=n, block_rows=block_rows,
        first_partial_block=first_partial_block, num_blocks=num_blocks)

    data_map = lambda j: (j, 0)

    stats, acc_plane = pl.pallas_call(
        kernel,
        grid=(num_blocks,),
        in_specs=[
            pl.BlockSpec((block_rows, LANES), data_map),
            pl.BlockSpec((block_rows, LANES), data_map),
        ],
        out_specs=(
            pl.BlockSpec((1, 32, LANES), lambda j: (j, 0, 0)),
            pl.BlockSpec((block_rows, LANES), data_map),
        ),
        out_shape=(
            jax.ShapeDtypeStruct((num_blocks, 32, LANES), jnp.float32),
            jax.ShapeDtypeStruct((total_rows, LANES), jnp.int8),
        ),
        compiler_params=pltpu.CompilerParams(
            dimension_semantics=("parallel",),
            vmem_limit_bytes=40 * 1024 * 1024,
        ),
    )(pi2, rf2)

    # Tiny epilogue: combine per-block (4, 8, 128) partial sums and divide.
    sums = stats.reshape(num_blocks, 4, 8, LANES).sum(axis=(0, 2, 3))
    inv_n = 1.0 / n
    acc_full = (acc_plane.reshape(-1)[:n] != 0).reshape(S, B, T)
    return {
        "loss": sums[0] * inv_n,
        "pi_logratios": sums[1] * inv_n,
        "ref_logratios": sums[2] * inv_n,
        "accuracy_implicit": sums[3] * inv_n,
        "accuracy_implicit_full": acc_full,
    }


def _reference(logprobs, ref_logprobs, choices, beta):
    """Pure-JAX reference mirroring the PyTorch DPOLoss.forward exactly."""
    S, B, T, _ = logprobs.shape
    ch = jnp.broadcast_to(choices[None, :, :, 0], (S, B, T))

    def get_ratios(lp):
        a = lp[..., 0]
        b = lp[..., 1]
        chosen = jnp.where(ch == 1, b, a)
        rejected = jnp.where(ch == 1, a, b)
        return chosen, rejected

    pi_c, pi_r = get_ratios(logprobs)
    rf_c, rf_r = get_ratios(ref_logprobs)
    pi_lr = pi_c - pi_r
    rf_lr = rf_c - rf_r
    logits = pi_lr - rf_lr
    losses = -jax.nn.log_sigmoid(beta * logits)
    irc = beta * (pi_c - rf_c)
    irr = beta * (pi_r - rf_r)
    acc_full = irc > irr
    return {
        "loss": losses.mean(),
        "pi_logratios": pi_lr.mean(),
        "ref_logratios": rf_lr.mean(),
        "accuracy_implicit": acc_full.astype(jnp.float32).mean(),
        "accuracy_implicit_full": acc_full,
    }


if __name__ == "__main__":
    key = jax.random.PRNGKey(0)
    beta = 0.1   # cfg.beta_dpo (deterministic in-script "config")

    # Small case (module-implied shapes) + a larger case exercising multi-block
    # gridding, the parallel axis, the ragged tail block, and int8 acc output.
    for (S, B, T) in [(4, 2, 8), (8, 8, 8200)]:
        k1, k2, k3 = jax.random.split(
            jax.random.fold_in(key, S * 1_000_000 + B * 100_000 + T), 3)
        logprobs = jax.random.normal(k1, (S, B, T, 2), dtype=jnp.float32)
        ref_logprobs = jax.random.normal(k2, (S, B, T, 2), dtype=jnp.float32)
        choices = jax.random.bernoulli(k3, 0.5, (B, T, 1)).astype(jnp.int32)

        out = dpo_loss(logprobs, ref_logprobs, choices, beta=beta)
        jax.block_until_ready(out)

        ref = _reference(logprobs, ref_logprobs, choices, beta)
        for name in ("loss", "pi_logratios", "ref_logratios", "accuracy_implicit"):
            assert jnp.allclose(out[name], ref[name], atol=1e-5, rtol=1e-5), (
                name, out[name], ref[name])
        assert out["accuracy_implicit_full"].shape == (S, B, T)
        # fp association at the z==0 decision boundary can flip a measure-zero set
        # of elements between the two (mathematically identical) formulations.
        n_elem = S * B * T
        mismatch = int(jnp.sum(out["accuracy_implicit_full"]
                               != ref["accuracy_implicit_full"]))
        assert mismatch <= 1 + n_elem // 100_000, mismatch

    print("KERNEL_OK")
</pallas_src>

<mosaic_0001>
module attributes {stable_mosaic.version = 11 : i64} {
  func.func @_dpo_kernel(%arg0: i32, %arg1: memref<32x128xf32, #tpu.memory_space<vmem>>, %arg2: memref<32x128xf32, #tpu.memory_space<vmem>>, %arg3: memref<1x32x128xf32, #tpu.memory_space<vmem>>, %arg4: memref<32x128xi8, #tpu.memory_space<vmem>>) attributes {dimension_semantics = [#tpu.dimension_semantics<parallel>], iteration_bounds = array<i64: 1>, scalar_prefetch = 0 : i64, scratch_operands = 0 : i64, tpu.core_type = #tpu.core_type<tc>, window_params = [{transform_indices = @transform_0, window_bounds = array<i64: 32, 128>}, {transform_indices = @transform_1, window_bounds = array<i64: 32, 128>}, {transform_indices = @transform_2, window_bounds = array<i64: 1, 32, 128>}, {transform_indices = @transform_3, window_bounds = array<i64: 32, 128>}]} {
    %c0 = arith.constant 0 : index
    %c0_0 = arith.constant 0 : index
    %0 = vector.load %arg1[%c0, %c0_0] : memref<32x128xf32, #tpu.memory_space<vmem>>, vector<32x128xf32>
    %c0_1 = arith.constant 0 : index
    %c0_2 = arith.constant 0 : index
    %1 = vector.load %arg2[%c0_1, %c0_2] : memref<32x128xf32, #tpu.memory_space<vmem>>, vector<32x128xf32>
    %2 = arith.subf %0, %1 : vector<32x128xf32>
    %cst = arith.constant 1.000000e-01 : f32
    %3 = vector.broadcast %cst : f32 to vector<32x128xf32>
    %4 = arith.mulf %3, %2 : vector<32x128xf32>
    %cst_3 = arith.constant 0.000000e+00 : f32
    %5 = vector.broadcast %cst_3 : f32 to vector<32x128xf32>
    %6 = arith.subf %5, %4 : vector<32x128xf32>
    %cst_4 = arith.constant 0.000000e+00 : f32
    %7 = vector.broadcast %cst_4 : f32 to vector<32x128xf32>
    %8 = arith.maximumf %6, %7 : vector<32x128xf32>
    %9 = math.absf %4 : vector<32x128xf32>
    %cst_5 = arith.constant 0.000000e+00 : f32
    %10 = vector.broadcast %cst_5 : f32 to vector<32x128xf32>
    %11 = arith.subf %10, %9 : vector<32x128xf32>
    %12 = math.exp %11 : vector<32x128xf32>
    %13 = math.log1p %12 : vector<32x128xf32>
    %14 = arith.addf %8, %13 : vector<32x128xf32>
    %cst_6 = arith.constant 0.000000e+00 : f32
    %15 = vector.broadcast %cst_6 : f32 to vector<32x128xf32>
    %16 = arith.cmpf ogt, %4, %15 : vector<32x128xf32>
    %17 = arith.extui %16 : vector<32x128xi1> to vector<32x128xi8>
    %c0_7 = arith.constant 0 : index
    %c0_8 = arith.constant 0 : index
    %18 = vector.load %arg4[%c0_7, %c0_8] : memref<32x128xi8, #tpu.memory_space<vmem>>, vector<32x128xi8>
    tpu.vector_store %arg4[%c0_7, %c0_8], %17 {strides = array<i32>} : memref<32x128xi8, #tpu.memory_space<vmem>>, vector<32x128xi8>,
    %19 = arith.extui %16 : vector<32x128xi1> to vector<32x128xi32>
    %20 = arith.sitofp %19 : vector<32x128xi32> to vector<32x128xf32>
    %c32_i32 = arith.constant 32 : i32
    %21 = arith.muli %arg0, %c32_i32 : i32
    %22 = tpu.iota {dimensions = array<i32: 0>} : vector<32x128xi32>
    %23 = vector.broadcast %21 : i32 to vector<32x128xi32>
    %24 = arith.addi %22, %23 : vector<32x128xi32>
    %c0_i32 = arith.constant 0 : i32
    %25 = vector.broadcast %c0_i32 : i32 to vector<32x128xi32>
    %26 = arith.cmpi slt, %24, %25 : vector<32x128xi32>
    %27 = tpu.iota {dimensions = array<i32: 1>} : vector<32x128xi32>
    %c0_i32_9 = arith.constant 0 : i32
    %28 = vector.broadcast %c0_i32_9 : i32 to vector<32x128xi32>
    %29 = arith.cmpi eq, %24, %28 : vector<32x128xi32>
    %c64_i32 = arith.constant 64 : i32
    %30 = vector.broadcast %c64_i32 : i32 to vector<32x128xi32>
    %31 = arith.cmpi slt, %27, %30 : vector<32x128xi32>
    %32 = arith.andi %29, %31 : vector<32x128xi1>
    %33 = arith.ori %26, %32 : vector<32x128xi1>
    %34 = arith.extui %33 : vector<32x128xi1> to vector<32x128xi32>
    %35 = arith.sitofp %34 : vector<32x128xi32> to vector<32x128xf32>
    %36 = arith.mulf %14, %35 : vector<32x128xf32>
    %37 = arith.mulf %0, %35 : vector<32x128xf32>
    %38 = arith.mulf %1, %35 : vector<32x128xf32>
    %39 = arith.mulf %20, %35 : vector<32x128xf32>
    %40 = vector.shape_cast %36 : vector<32x128xf32> to vector<4x8x128xf32>
    %cst_10 = arith.constant dense<0.000000e+00> : vector<8x128xf32>
    %41 = vector.multi_reduction <add>, %40, %cst_10 [0] : vector<4x8x128xf32> to vector<8x128xf32>
    %c0_11 = arith.constant 0 : index
    %c0_12 = arith.constant 0 : index
    %c0_13 = arith.constant 0 : index
    %42 = vector.load %arg3[%c0_11, %c0_12, %c0_13] : memref<1x32x128xf32, #tpu.memory_space<vmem>>, vector<1x8x128xf32>
    %43 = vector.shape_cast %42 : vector<1x8x128xf32> to vector<8x128xf32>
    %44 = vector.shape_cast %41 : vector<8x128xf32> to vector<1x8x128xf32>
    tpu.vector_store %arg3[%c0_11, %c0_12, %c0_13], %44 {strides = array<i32>} : memref<1x32x128xf32, #tpu.memory_space<vmem>>, vector<1x8x128xf32>,
    %45 = vector.shape_cast %37 : vector<32x128xf32> to vector<4x8x128xf32>
    %cst_14 = arith.constant dense<0.000000e+00> : vector<8x128xf32>
    %46 = vector.multi_reduction <add>, %45, %cst_14 [0] : vector<4x8x128xf32> to vector<8x128xf32>
    %c0_15 = arith.constant 0 : index
    %c8 = arith.constant 8 : index
    %c0_16 = arith.constant 0 : index
    %47 = vector.load %arg3[%c0_15, %c8, %c0_16] : memref<1x32x128xf32, #tpu.memory_space<vmem>>, vector<1x8x128xf32>
    %48 = vector.shape_cast %47 : vector<1x8x128xf32> to vector<8x128xf32>
    %49 = vector.shape_cast %46 : vector<8x128xf32> to vector<1x8x128xf32>
    tpu.vector_store %arg3[%c0_15, %c8, %c0_16], %49 {strides = array<i32>} : memref<1x32x128xf32, #tpu.memory_space<vmem>>, vector<1x8x128xf32>,
    %50 = vector.shape_cast %38 : vector<32x128xf32> to vector<4x8x128xf32>
    %cst_17 = arith.constant dense<0.000000e+00> : vector<8x128xf32>
    %51 = vector.multi_reduction <add>, %50, %cst_17 [0] : vector<4x8x128xf32> to vector<8x128xf32>
    %c0_18 = arith.constant 0 : index
    %c16 = arith.constant 16 : index
    %c0_19 = arith.constant 0 : index
    %52 = vector.load %arg3[%c0_18, %c16, %c0_19] : memref<1x32x128xf32, #tpu.memory_space<vmem>>, vector<1x8x128xf32>
    %53 = vector.shape_cast %52 : vector<1x8x128xf32> to vector<8x128xf32>
    %54 = vector.shape_cast %51 : vector<8x128xf32> to vector<1x8x128xf32>
    tpu.vector_store %arg3[%c0_18, %c16, %c0_19], %54 {strides = array<i32>} : memref<1x32x128xf32, #tpu.memory_space<vmem>>, vector<1x8x128xf32>,
    %55 = vector.shape_cast %39 : vector<32x128xf32> to vector<4x8x128xf32>
    %cst_20 = arith.constant dense<0.000000e+00> : vector<8x128xf32>
    %56 = vector.multi_reduction <add>, %55, %cst_20 [0] : vector<4x8x128xf32> to vector<8x128xf32>
    %c0_21 = arith.constant 0 : index
    %c24 = arith.constant 24 : index
    %c0_22 = arith.constant 0 : index
    %57 = vector.load %arg3[%c0_21, %c24, %c0_22] : memref<1x32x128xf32, #tpu.memory_space<vmem>>, vector<1x8x128xf32>
    %58 = vector.shape_cast %57 : vector<1x8x128xf32> to vector<8x128xf32>
    %59 = vector.shape_cast %56 : vector<8x128xf32> to vector<1x8x128xf32>
    tpu.vector_store %arg3[%c0_21, %c24, %c0_22], %59 {strides = array<i32>} : memref<1x32x128xf32, #tpu.memory_space<vmem>>, vector<1x8x128xf32>,
    return
  }
  func.func @transform_0(%arg0: i32) -> (i32, i32) {
    %c0_i32 = arith.constant 0 : i32
    %c0_i32_0 = arith.constant 0 : i32
    return %arg0, %c0_i32 : i32, i32
  }
  func.func @transform_1(%arg0: i32) -> (i32, i32) {
    %c0_i32 = arith.constant 0 : i32
    %c0_i32_0 = arith.constant 0 : i32
    return %arg0, %c0_i32 : i32, i32
  }
  func.func @transform_2(%arg0: i32) -> (i32, i32, i32) {
    %c0_i32 = arith.constant 0 : i32
    %c0_i32_0 = arith.constant 0 : i32
    %c0_i32_1 = arith.constant 0 : i32
    return %arg0, %c0_i32, %c0_i32_0 : i32, i32, i32
  }
  func.func @transform_3(%arg0: i32) -> (i32, i32) {
    %c0_i32 = arith.constant 0 : i32
    %c0_i32_0 = arith.constant 0 : i32
    return %arg0, %c0_i32 : i32, i32
  }
}

</mosaic_0001>

<bundles_post_ra>
// kernel: dpo_loss.1
= control target key start
LH: loop header
LB: loop body
LE: loop exit
PB: predicated region body
PF: predicated region fallthrough
CT: control target
= control target key end

     0   :  { %v128_v0 = vlaneseq  ;;  %v228_v30 = vmov 0.0   ;;  %v229_v35 = vmov 0   ;;  %s362_s0 = inlined_call_operand.vmem [shape: f32[32,128], index: 0, kind: input, shape index: {}]   ;;  %s363_s1 = inlined_call_operand.vmem [shape: f32[32,128], index: 1, kind: input, shape index: {}]   ;;  %s364_s3 = inlined_call_operand.vmem [shape: s8[32,128], index: 3, kind: output, shape index: {1}]   ;;  %s365_s2 = inlined_call_operand.vmem [shape: f32[1,32,128], index: 2, kind: output, shape index: {0}]  }
   0x1   :  { %v15_v1 = vld [vmem:[%s362_s0] sm:$0xff]  ;;  %v16_v2 = vld [vmem:[%s362_s0 + $0x8] sm:$0xff]  ;;  %v17_v3 = vld [vmem:[%s362_s0 + $0x10] sm:$0xff] }
   0x2   :  { %v18_v4 = vld [vmem:[%s362_s0 + $0x18] sm:$0xff]  ;;  %v265_v5 = vld [vmem:[%s363_s1] sm:$0xff]  ;;  %v20_v6 = vld [vmem:[%s363_s1 + $0x8] sm:$0xff]  ;;  %v129_v7 = vshrl.u32 %v128_v0, 7  ;;  %v143_v8 = vand.u32 127, %v128_v0  ;;  %v170_v26 = vmul.f32 0.0, %v16_v2 }
   0x3   :  { %v21_v9 = vld [vmem:[%s363_s1 + $0x10] sm:$0xff]  ;;  %v22_v10 = vld [vmem:[%s363_s1 + $0x18] sm:$0xff]  ;;  %v23_v11 = vsub.f32 %v15_v1, %v265_v5  ;;  %v24_v12 = vsub.f32 %v16_v2, %v20_v6  ;;  %v171_v27 = vmul.f32 0.0, %v17_v3  ;;  %v172_v32 = vmul.f32 0.0, %v18_v4 }
   0x4   :  { %v25_v13 = vsub.f32 %v17_v3, %v21_v9  ;;  %v26_v14 = vsub.f32 %v18_v4, %v22_v10  ;;  %vm144_vm0 = vcmp.eq.s32.totalorder %v129_v7, 0  ;;  %vm148_vm1 = vcmp.lt.s32.totalorder %v143_v8, 64 }
   0x5   :  { %v277_v15 = vmul.f32 0.1, %v23_v11  ;;  %v279_v16 = vmul.f32 0.1, %v24_v12  ;;  %vm149_vm4 = vmand %vm144_vm0, %vm148_vm1  ;;  %v174_v46 = vmul.f32 0.0, %v20_v6  ;;  %v175_v49 = vmul.f32 0.0, %v21_v9 }
   0x6   :  { %v281_v17 = vmul.f32 0.1, %v25_v13  ;;  %v283_v18 = vmul.f32 0.1, %v26_v14  ;;  %v307_v31 = vsel %vm149_vm4, 1.0, %v228_v30  ;;  %v176_v52 = vmul.f32 0.0, %v22_v10 }
   0x7   :  { %v39_v19 = vand.u32 2147483647, %v277_v15  ;;  %v40_v20 = vand.u32 2147483647, %v279_v16  ;;  %vm95_vm2 = vcmp.gt.f32.partialorder %v277_v15, 0.0  ;;  %vm96_vm3 = vcmp.gt.f32.partialorder %v279_v16, 0.0 }
   0x8   :  { %v41_v21 = vand.u32 2147483647, %v281_v17  ;;  %v42_v22 = vand.u32 2147483647, %v283_v18  ;;  %vm97_vm5 = vcmp.gt.f32.partialorder %v281_v17, 0.0  ;;  %vm98_vm6 = vcmp.gt.f32.partialorder %v283_v18, 0.0  ;;  %vm297_vm7 = vmpackc.low %vm96_vm3, %vm95_vm2 }
   0x9   :  { %v43_v24 = vsub.f32 0.0, %v39_v19  ;;  %v44_v25 = vsub.f32 0.0, %v40_v20  ;;  %vm100_vm8 = vmpackc.low %vm98_vm6, %vm97_vm5  ;;  %v169_v43 = vmul.f32 %v307_v31, %v15_v1  ;;  %v173_v56 = vmul.f32 %v307_v31, %v265_v5 }
   0xa   :  { %v45_v28 = vsub.f32 0.0, %v41_v21  ;;  %v46_v29 = vsub.f32 0.0, %v42_v22  ;;  %vm101_vm9 = vmpackc.even %vm100_vm8, %vm297_vm7  ;;  %v205_v57 = vsel %vm95_vm2, 1.0, %v228_v30  ;;  %v206_v58 = vsel %vm96_vm3, 1.0, %v228_v30 }
   0xb   :  { %v47_v33 = vmul.f32 1.442695, %v43_v24  ;;  %v49_v34 = vmul.f32 1.442695, %v44_v25  ;;  %v102_v36 = vsel %vm101_vm9, 16843009, %v229_v35  ;;  %v185_v55 = vadd.f32 %v170_v26, %v169_v43 }
   0xc   :  { %v51_v37 = vmul.f32 1.442695, %v45_v28  ;;  %v53_v38 = vmul.f32 1.442695, %v46_v29  ;;  %v103_v39 = vunpack.c.0.s8 %v102_v36  ;;  %v104_v40 = vunpack.c.1.s8 %v102_v36 }
   0xd   :  { %212 = vpow2.f32 %v47_v33  ;;  %v105_v41 = vunpack.c.2.s8 %v102_v36  ;;  %v106_v42 = vunpack.c.3.s8 %v102_v36  ;;  %v207_v59 = vsel %vm97_vm5, 1.0, %v228_v30 }
   0xe   :  { %214 = vpow2.f32 %v49_v34  ;;  %v107_v44 = vpack.c.b16 %v103_v39, %v103_v39  ;;  %v109_v45 = vpack.c.b16 %v104_v40, %v104_v40  ;;  %v208_v60 = vsel %vm98_vm6, 1.0, %v228_v30 }
   0xf   :  { %216 = vpow2.f32 %v51_v37  ;;  %v111_v47 = vpack.c.b16 %v105_v41, %v105_v41  ;;  %v113_v48 = vpack.c.b16 %v106_v42, %v106_v42  ;;  %v186_v61 = vadd.f32 %v185_v55, %v171_v27 }
  0x10   :  { %218 = vpow2.f32 %v53_v38  ;;  %v108_v50 = vpack.c.b8 %v107_v44, %v107_v44  ;;  %v110_v51 = vpack.c.b8 %v109_v45, %v109_v45  ;;  %v189_v62 = vadd.f32 %v174_v46, %v173_v56 }
  0x11   :  { %v112_v53 = vpack.c.b8 %v111_v47, %v111_v47  ;;  %v114_v54 = vpack.c.b8 %v113_v48, %v113_v48  ;;  %v177_v63 = vmul.f32 %v307_v31, %v205_v57  ;;  %v178_v0 = vmul.f32 0.0, %v206_v58 }
  0x12   :  { %115 = vst [vmem:[%s364_s3] sm:$0x3] %v108_v50  ;;  %116 = vst [vmem:[%s364_s3 + $0x2] sm:$0x3] %v110_v51  ;;  %v179_v1 = vmul.f32 0.0, %v207_v59  ;;  %v187_v2 = vadd.f32 %v186_v61, %v172_v32  ;;  %v190_v3 = vadd.f32 %v189_v62, %v175_v49  ;;  %v180_v4 = vmul.f32 0.0, %v208_v60 }
  0x13   :  { %117 = vst [vmem:[%s364_s3 + $0x4] sm:$0x3] %v112_v53  ;;  %118 = vst [vmem:[%s364_s3 + $0x6] sm:$0x3] %v114_v54  ;;  %v193_v5 = vadd.f32 %v178_v0, %v177_v63  ;;  %v31_v26 = vsub.f32 0.0, %v277_v15  ;;  %v32_v29 = vsub.f32 0.0, %v279_v16 }
  0x14   :  { %188 = vst [vmem:[%s365_s2 + $0x8] sm:$0xff] %v187_v2  ;;  %v191_v6 = vadd.f32 %v190_v3, %v176_v52  ;;  %v33_v33 = vsub.f32 0.0, %v281_v17  ;;  %v34_v35 = vsub.f32 0.0, %v283_v18 }
  0x15   :  { %v194_v7 = vadd.f32 %v193_v5, %v179_v1  ;;  %v35_v39 = vmax.f32 %v31_v26, 0.0  ;;  %v36_v43 = vmax.f32 %v32_v29, 0.0 }
  0x16   :  { %192 = vst [vmem:[%s365_s2 + $0x10] sm:$0xff] %v191_v6  ;;  %v37_v18 = vmax.f32 %v33_v33, 0.0  ;;  %v38_v51 = vmax.f32 %v34_v35, 0.0 }
  0x17   :  { %v195_v8 = vadd.f32 %v194_v7, %v180_v4 }
  0x19   :  { %196 = vst [vmem:[%s365_s2 + $0x18] sm:$0xff] %v195_v8 }
  0x1a   :  { %v213_v9 = vpop.eup %212 }
  0x1b   :  { %v215_v10 = vpop.eup %214  ;;  %v55_v11 = vadd.f32 1.0, %v213_v9  ;;  %v58_v21 = vmul.f32 -0.5, %v213_v9  ;;  %v61_v27 = vand.u32 2147483647, %v213_v9 }
  0x1c   :  { %v217_v12 = vpop.eup %216  ;;  %v64_v13 = vadd.f32 1.0, %v215_v10  ;;  %v67_v22 = vmul.f32 -0.5, %v215_v10  ;;  %v70_v30 = vand.u32 2147483647, %v215_v10 }
  0x1d   :  { %v219_v14 = vpop.eup %218  ;;  %220 = vlog2.f32 %v55_v11  ;;  %v73_v19 = vadd.f32 1.0, %v217_v12  ;;  %v76_v23 = vmul.f32 -0.5, %v217_v12  ;;  %v59_v24 = vadd.f32 1.0, %v58_v21 }
  0x1e   :  { %222 = vlog2.f32 %v64_v13  ;;  %v82_v20 = vadd.f32 1.0, %v219_v14  ;;  %v85_v25 = vmul.f32 -0.5, %v219_v14  ;;  %v68_v28 = vadd.f32 1.0, %v67_v22 }
  0x1f   :  { %224 = vlog2.f32 %v73_v19  ;;  %v77_v32 = vadd.f32 1.0, %v76_v23  ;;  %v79_v34 = vand.u32 2147483647, %v217_v12  ;;  %v60_v36 = vmul.f32 %v213_v9, %v59_v24 }
  0x20   :  { %226 = vlog2.f32 %v82_v20  ;;  %v86_v37 = vadd.f32 1.0, %v85_v25  ;;  %vm346_vm10 = vcmp.lt.f32.partialorder %v61_v27, 0.0004427343  ;;  %v69_v15 = vmul.f32 %v215_v10, %v68_v28 }
  0x21   :  { %v88_v41 = vand.u32 2147483647, %v219_v14  ;;  %vm350_vm11 = vcmp.lt.f32.partialorder %v70_v30, 0.0004427343  ;;  %v78_v17 = vmul.f32 %v217_v12, %v77_v32  ;;  %vm80_vm12 = vcmp.lt.f32.partialorder %v79_v34, 0.0004427343 }
  0x22   :  { %v87_v49 = vmul.f32 %v219_v14, %v86_v37 }
  0x23   :  { %vm89_vm13 = vcmp.lt.f32.partialorder %v88_v41, 0.0004427343 }
  0x2a   :  { %v221_v38 = vpop.eup %220 }
  0x2b   :  { %v223_v42 = vpop.eup %222  ;;  %v57_v16 = vmul.f32 0.6931472, %v221_v38 }
  0x2c   :  { %v225_v45 = vpop.eup %224  ;;  %v66_v46 = vmul.f32 0.6931472, %v223_v42 }
  0x2d   :  { %v63_v47 = vsel %vm346_vm10, %v60_v36, %v57_v16  ;;  %v75_v48 = vmul.f32 0.6931472, %v225_v45  ;;  %v227_v50 = vpop.eup %226 }
  0x2e   :  { %v72_v52 = vsel %vm350_vm11, %v69_v15, %v66_v46  ;;  %v91_v53 = vadd.f32 %v63_v47, %v35_v39  ;;  %v84_v55 = vmul.f32 0.6931472, %v227_v50 }
  0x2f   :  { %v81_v54 = vsel %vm80_vm12, %v78_v17, %v75_v48  ;;  %v92_v56 = vadd.f32 %v72_v52, %v36_v43 }
  0x30   :  { %v93_v57 = vadd.f32 %v81_v54, %v37_v18  ;;  %v165_v58 = vmul.f32 %v307_v31, %v91_v53  ;;  %v90_v59 = vsel %vm89_vm13, %v87_v49, %v84_v55 }
  0x31   :  { %v166_v60 = vmul.f32 0.0, %v92_v56  ;;  %v94_v61 = vadd.f32 %v90_v59, %v38_v51 }
  0x32   :  { %v167_v62 = vmul.f32 0.0, %v93_v57 }
  0x33   :  { %v181_v63 = vadd.f32 %v166_v60, %v165_v58  ;;  %v168_v0 = vmul.f32 0.0, %v94_v61 }
  0x35   :  { %v182_v1 = vadd.f32 %v181_v63, %v167_v62 }
  0x37   :  { %v183_v2 = vadd.f32 %v182_v1, %v168_v0 }
  0x39   :  { %184 = vst [vmem:[%s365_s2] sm:$0xff] %v183_v2 }

</bundles_post_ra>
